<compile_context>
chip_gen: v6e
topology: v6e:2x2x1
jax: 0.10.0
libtpu: 0.0.40
codegen_flags: <defaults>
</compile_context>

<pallas_src>
import math
from functools import partial

import jax
import jax.numpy as jnp
from jax.experimental import pallas as pl
from jax.experimental.pallas import tpu as pltpu

LN_EPS = 1e-5      # F.layer_norm default
L2_EPS = 1e-12     # F.normalize default


# --------------------------------------------------------------------------
# Generation-aware configuration
# --------------------------------------------------------------------------
def _tpu_generation():
    try:
        kind = jax.devices()[0].device_kind.lower()
    except Exception:
        return 6
    for g in (7, 6, 5, 4):
        if f"v{g}" in kind:
            return g
    return 6


def _tiles_and_pad(n, ts_t, tq_t, tk_t):
    """Pick (ts, tq, tk, n_pad) so every tile divides n_pad (no gcd pathology).

    Small n: tiles == n rounded up to 8 (minimal padding).
    Large n: pad to a multiple of 256 (waste < 256 rows) and halve each
    power-of-two target until it divides n_pad (never below 256).
    """
    n8 = -(-n // 8) * 8
    if n8 <= tq_t:
        return n8, n8, n8, n8
    g = 256
    n_pad = -(-n8 // g) * g

    def fit(t):
        t = min(t, n_pad)
        while n_pad % t:
            t //= 2
        return t

    return fit(ts_t), fit(tq_t), fit(tk_t), n_pad


# --------------------------------------------------------------------------
# Kernel 1: LayerNorm + wide q/k/v projections + per-head l2norm/scales
# --------------------------------------------------------------------------
def _project_kernel(x_ref, gamma_ref, wq_ref, wk_ref, wv_ref, qs_ref, ks_ref,
                    q_out, k_out, v_out, *, heads, dim_head):
    d = dim_head

    # LayerNorm (beta == 0), computed once per seq tile in f32.
    x = x_ref[0].astype(jnp.float32)                            # (ts, dim)
    mu = jnp.mean(x, axis=-1, keepdims=True)
    xc = x - mu
    var = jnp.mean(xc * xc, axis=-1, keepdims=True)
    xn = xc * jax.lax.rsqrt(var + LN_EPS) * gamma_ref[...]       # (ts, dim)
    xnb = xn.astype(jnp.bfloat16)                                # bf16 MXU side

    # Full-width projections: N = inner (all heads at once).
    q = jnp.dot(xnb, wq_ref[...], preferred_element_type=jnp.float32)  # (ts, inner)
    k = jnp.dot(xnb, wk_ref[...], preferred_element_type=jnp.float32)
    v = jnp.dot(xnb, wv_ref[...], preferred_element_type=jnp.float32)

    def l2norm(t):  # matches F.normalize(dim=-1, eps=1e-12); rsqrt -> EUP
        ss = jnp.sum(t * t, axis=-1, keepdims=True)
        return t * jax.lax.rsqrt(jnp.maximum(ss, L2_EPS * L2_EPS))

    qs = qs_ref[...]     # (1, d) -- q_scale * 1/sqrt(d) (SDPA scale folded in)
    ks = ks_ref[...]     # (1, d)

    for h in range(heads):                 # static per-head lane slices
        sl = slice(h * d, (h + 1) * d)
        q_out[0, h] = (l2norm(q[:, sl]) * qs).astype(q_out.dtype)
        k_out[0, h] = (l2norm(k[:, sl]) * ks).astype(k_out.dtype)
        v_out[0, h] = v[:, sl].astype(v_out.dtype)


# --------------------------------------------------------------------------
# Kernel 2: flash attention with null-kv + single wide output projection
# --------------------------------------------------------------------------
def _flash_kernel(q_ref, k_ref, v_ref, nk_ref, nv_ref, wo_ref, o_ref,
                  m_scr, l_scr, acc_scr, out_scr,
                  *, heads, dim_head, kv_tile, n_tokens, n_padded,
                  use_bf16_exp):
    hi = pl.program_id(2)                # head (reduction axis)
    ki = pl.program_id(3)                # kv tile (reduction axis)
    last_h = pl.num_programs(2) - 1
    last_k = pl.num_programs(3) - 1
    d = dim_head

    q = q_ref[0, 0]                      # (tq, d) bf16, already scaled/normalized

    @pl.when(ki == 0)
    def _init():
        # Null key/value folded in as the online-softmax initial state:
        # m = s_null, l = exp(0) = 1, acc = 1 * null_v.
        s_null = jnp.sum(q.astype(jnp.float32) * nk_ref[0],
                         axis=-1, keepdims=True)                     # (tq, 1)
        m_scr[...] = s_null
        l_scr[...] = jnp.ones_like(l_scr)
        acc_scr[...] = jnp.broadcast_to(nv_ref[0].astype(jnp.float32),
                                        acc_scr.shape)

    k = k_ref[0, 0]                      # (tk, d) bf16
    v = v_ref[0, 0]                      # (tk, d) bf16
    s = jax.lax.dot_general(q, k, (((1,), (1,)), ((), ())),
                            preferred_element_type=jnp.float32)      # (tq, tk)

    if n_padded != n_tokens:             # mask padded kv columns (static branch)
        col = ki * kv_tile + jax.lax.broadcasted_iota(jnp.int32, s.shape, 1)
        s = jnp.where(col < n_tokens, s, -jnp.inf)

    m_prev = m_scr[...]
    m_new = jnp.maximum(m_prev, jnp.max(s, axis=-1, keepdims=True))
    alpha = jnp.exp(m_prev - m_new)                                   # (tq, 1) f32
    sm = s - m_new
    if use_bf16_exp:                     # v6e/v7x: bf16 EUP path, m/l stay f32
        p = jnp.exp(sm.astype(jnp.bfloat16))
    else:                                # v5e: no bf16 EUP -> keep f32 exp
        p = jnp.exp(sm)
    l_scr[...] = alpha * l_scr[...] + jnp.sum(p.astype(jnp.float32),
                                              axis=-1, keepdims=True)
    acc_scr[...] = alpha * acc_scr[...] + jnp.dot(
        p.astype(jnp.bfloat16), v, preferred_element_type=jnp.float32)
    m_scr[...] = m_new

    @pl.when(ki == last_k)
    def _store_head():
        inv_l = pl.reciprocal(l_scr[...], approx=True)                # EUP
        o_h = acc_scr[...] * inv_l                                    # (tq, d) f32
        # Static per-head lane slice of the (tq, inner) scratch.
        for h in range(heads):
            @pl.when(hi == h)
            def _(h=h):
                out_scr[:, h * d:(h + 1) * d] = o_h

    @pl.when((hi == last_h) & (ki == last_k))
    def _project():
        # Single wide projection: K = inner (not heads x K = d matmuls).
        o = jnp.dot(out_scr[...].astype(jnp.bfloat16), wo_ref[...],
                    preferred_element_type=jnp.float32)
        o_ref[0] = o.astype(o_ref.dtype)


# --------------------------------------------------------------------------
# Wrapper
# --------------------------------------------------------------------------
def attention_forward(x, params, heads, dim_head):
    b, n, dim = x.shape
    d = dim_head
    inner = heads * d
    f32, bf16 = jnp.float32, jnp.bfloat16

    gen = _tpu_generation()
    if gen >= 7:
        ts_t, tq_t, tk_t, cap = 512, 512, 1024, 44 << 20   # 64 MiB VMEM per TC
    elif gen >= 6:
        ts_t, tq_t, tk_t, cap = 512, 512, 1024, 64 << 20
    else:                                                   # v5e / older
        ts_t, tq_t, tk_t, cap = 256, 256, 512, 32 << 20
    use_bf16_exp = gen >= 6

    ts, tq, tk, n_pad = _tiles_and_pad(n, ts_t, tq_t, tk_t)
    # v7x: keep a parallel grid axis with extent >= 2 when possible.
    if gen >= 7 and b == 1 and n_pad == tq and tq >= 16:
        tq //= 2

    # ---- host-side parameter re-layout (bf16 MXU sides, full-width) --------
    wq = params["wq"].astype(bf16)                       # (dim, inner)
    wk = params["wkv"][:, :inner].astype(bf16)           # (dim, inner)
    wv = params["wkv"][:, inner:].astype(bf16)           # (dim, inner)
    wo = params["wo"].astype(bf16)                       # (inner, dim)

    gamma = params["gamma"].astype(f32).reshape(1, dim)
    inv_sqrt_d = 1.0 / math.sqrt(d)
    q_scale = (params["q_scale"].astype(f32) * inv_sqrt_d).reshape(1, d)
    k_scale = params["k_scale"].astype(f32).reshape(1, d)

    # pre-normalize the null key (l2norm * k_scale); null value unchanged
    nk = params["null_k"].astype(f32)
    nk_n = nk * jax.lax.rsqrt(
        jnp.maximum(jnp.sum(nk * nk, -1, keepdims=True), L2_EPS * L2_EPS))
    nk_n = (nk_n * params["k_scale"].astype(f32).reshape(1, d)).reshape(heads, 1, d)
    nv = params["null_v"].astype(f32).reshape(heads, 1, d)

    # Pad the sequence to a tile multiple (padded kv columns masked in-kernel).
    x_p = jnp.pad(x, ((0, 0), (0, n_pad - n), (0, 0))) if n_pad != n else x
    xb = x.dtype.itemsize

    # ---------------- kernel 1: LayerNorm + q/k/v projections ----------------
    proj_bytes = (2 * ts * dim * xb + 2 * dim * 4 + 3 * dim * inner * 2
                  + 2 * d * 4 + 6 * ts * inner * 2 + 4 * ts * inner * 4)
    proj_vmem = int(min(max(proj_bytes + (8 << 20), 16 << 20), cap))

    qkv_shape = jax.ShapeDtypeStruct((b, heads, n_pad, d), bf16)
    qkv_spec = pl.BlockSpec((1, heads, ts, d), lambda bi, si: (bi, 0, si, 0))
    q, k, v = pl.pallas_call(
        partial(_project_kernel, heads=heads, dim_head=d),
        out_shape=(qkv_shape, qkv_shape, qkv_shape),
        grid=(b, n_pad // ts),
        in_specs=[
            pl.BlockSpec((1, ts, dim), lambda bi, si: (bi, si, 0)),   # x (native dtype)
            pl.BlockSpec((1, dim), lambda bi, si: (0, 0)),            # gamma
            pl.BlockSpec((dim, inner), lambda bi, si: (0, 0)),        # wq
            pl.BlockSpec((dim, inner), lambda bi, si: (0, 0)),        # wk
            pl.BlockSpec((dim, inner), lambda bi, si: (0, 0)),        # wv
            pl.BlockSpec((1, d), lambda bi, si: (0, 0)),              # q_scale
            pl.BlockSpec((1, d), lambda bi, si: (0, 0)),              # k_scale
        ],
        out_specs=(qkv_spec, qkv_spec, qkv_spec),
        compiler_params=pltpu.CompilerParams(
            dimension_semantics=("parallel", "parallel"),
            vmem_limit_bytes=proj_vmem),
    )(x_p, gamma, wq, wk, wv, q_scale, k_scale)

    # ------------- kernel 2: flash attention + output projection -------------
    ob = x.dtype.itemsize
    flash_bytes = (2 * tq * d * 2 + 4 * tk * d * 2 + 2 * inner * dim * 2
                   + 2 * tq * dim * ob
                   + tq * inner * 4 + tq * d * 4 + 2 * tq * 4
                   + 3 * tq * tk * 4)           # (tq,tk) f32 score/p temporaries
    flash_vmem = int(min(max(flash_bytes + (8 << 20), 16 << 20), cap))

    out_pad = pl.pallas_call(
        partial(_flash_kernel, heads=heads, dim_head=d, kv_tile=tk,
                n_tokens=n, n_padded=n_pad, use_bf16_exp=use_bf16_exp),
        out_shape=jax.ShapeDtypeStruct((b, n_pad, dim), x.dtype),
        grid=(b, n_pad // tq, heads, n_pad // tk),
        in_specs=[
            pl.BlockSpec((1, 1, tq, d), lambda bi, qi, hi, ki: (bi, hi, qi, 0)),  # q
            pl.BlockSpec((1, 1, tk, d), lambda bi, qi, hi, ki: (bi, hi, ki, 0)),  # k
            pl.BlockSpec((1, 1, tk, d), lambda bi, qi, hi, ki: (bi, hi, ki, 0)),  # v
            pl.BlockSpec((1, 1, d), lambda bi, qi, hi, ki: (hi, 0, 0)),           # null k
            pl.BlockSpec((1, 1, d), lambda bi, qi, hi, ki: (hi, 0, 0)),           # null v
            pl.BlockSpec((inner, dim), lambda bi, qi, hi, ki: (0, 0)),            # wo
        ],
        out_specs=pl.BlockSpec((1, tq, dim), lambda bi, qi, hi, ki: (bi, qi, 0)),
        scratch_shapes=[
            pltpu.VMEM((tq, 1), jnp.float32),       # running max m
            pltpu.VMEM((tq, 1), jnp.float32),       # running denom l
            pltpu.VMEM((tq, d), jnp.float32),       # running numerator acc
            pltpu.VMEM((tq, inner), jnp.float32),   # per-head outputs (all heads)
        ],
        compiler_params=pltpu.CompilerParams(
            dimension_semantics=("parallel", "parallel", "arbitrary", "arbitrary"),
            vmem_limit_bytes=flash_vmem),
    )(q, k, v, nk_n, nv, wo)

    return out_pad[:, :n] if n_pad != n else out_pad


# --------------------------------------------------------------------------
# Pure-JAX f32 reference (faithful to the PyTorch forward), for verification
# --------------------------------------------------------------------------
def attention_reference(x, params, heads, dim_head):
    b, n, dim = x.shape
    d = dim_head
    inner = heads * d

    mu = x.mean(-1, keepdims=True)
    var = ((x - mu) ** 2).mean(-1, keepdims=True)
    xn = (x - mu) / jnp.sqrt(var + LN_EPS) * params["gamma"][0]

    q = xn @ params["wq"]
    kv = xn @ params["wkv"]
    k, v = kv[..., :inner], kv[..., inner:]

    split = lambda t: t.reshape(b, n, heads, d).transpose(0, 2, 1, 3)  # b h n d
    q, k, v = split(q), split(k), split(v)

    nk = jnp.broadcast_to(params["null_k"][None, :, None, :], (b, heads, 1, d))
    nv = jnp.broadcast_to(params["null_v"][None, :, None, :], (b, heads, 1, d))
    k = jnp.concatenate([nk, k], axis=2)
    v = jnp.concatenate([nv, v], axis=2)

    l2n = lambda t: t / jnp.maximum(
        jnp.sqrt(jnp.sum(t * t, -1, keepdims=True)), L2_EPS)
    q = l2n(q) * params["q_scale"][0]
    k = l2n(k) * params["k_scale"][0]

    s = jnp.einsum("bhnd,bhmd->bhnm", q, k) / math.sqrt(d)
    a = jax.nn.softmax(s, axis=-1)
    o = jnp.einsum("bhnm,bhmd->bhnd", a, v)
    o = o.transpose(0, 2, 1, 3).reshape(b, n, inner)
    return o @ params["wo"]


def init_params(key, dim, heads, dim_head, scale=8):
    inner = heads * dim_head
    k1, k2, k3, k4, k5 = jax.random.split(key, 5)
    typical_scale = dim_head ** (-0.5)
    scale_ratio = scale / typical_scale
    return {
        "gamma": jnp.ones((1, dim), jnp.float32),
        "wq": jax.random.normal(k1, (dim, inner), jnp.float32) * 0.05,
        "wkv": jax.random.normal(k2, (dim, 2 * inner), jnp.float32) * 0.05,
        "wo": jax.random.normal(k3, (inner, dim), jnp.float32) * 0.05,
        "q_scale": jnp.full((1, dim_head), scale_ratio, jnp.float32),
        "k_scale": jnp.ones((1, dim_head), jnp.float32),
        "null_k": jax.random.normal(k4, (heads, dim_head), jnp.float32),
        "null_v": jax.random.normal(k5, (heads, dim_head), jnp.float32),
    }


if __name__ == "__main__":
    b, n, dim = 2, 8, 32
    heads, dim_head = 2, 16

    key = jax.random.PRNGKey(0)
    kx, kp = jax.random.split(key)
    x = jax.random.normal(kx, (b, n, dim), jnp.float32)
    params = init_params(kp, dim, heads, dim_head)

    out = attention_forward(x, params, heads, dim_head)
    out = jax.block_until_ready(out)

    ref = attention_reference(x, params, heads, dim_head)
    assert out.shape == (b, n, dim)
    # bf16 MXU operands / bf16 exp -> tolerance loosened vs. the f32 reference
    assert jnp.allclose(out, ref, atol=5e-2, rtol=5e-2), (
        float(jnp.max(jnp.abs(out - ref))))

    print("KERNEL_OK")
</pallas_src>

<mosaic_0001>
module attributes {stable_mosaic.version = 11 : i64} {
  func.func @_project_kernel(%arg0: i32, %arg1: i32, %arg2: memref<1x8x32xf32, #tpu.memory_space<vmem>>, %arg3: memref<1x32xf32, #tpu.memory_space<vmem>>, %arg4: memref<32x32xbf16, #tpu.memory_space<vmem>>, %arg5: memref<32x32xbf16, #tpu.memory_space<vmem>>, %arg6: memref<32x32xbf16, #tpu.memory_space<vmem>>, %arg7: memref<1x16xf32, #tpu.memory_space<vmem>>, %arg8: memref<1x16xf32, #tpu.memory_space<vmem>>, %arg9: memref<1x2x8x16xbf16, #tpu.memory_space<vmem>>, %arg10: memref<1x2x8x16xbf16, #tpu.memory_space<vmem>>, %arg11: memref<1x2x8x16xbf16, #tpu.memory_space<vmem>>) attributes {dimension_semantics = [#tpu.dimension_semantics<parallel>, #tpu.dimension_semantics<parallel>], iteration_bounds = array<i64: 2, 1>, scalar_prefetch = 0 : i64, scratch_operands = 0 : i64, tpu.core_type = #tpu.core_type<tc>, window_params = [{transform_indices = @transform_0, window_bounds = array<i64: 1, 8, 32>}, {pipeline_mode = #tpu.pipeline_mode<synchronous>, transform_indices = @transform_1, window_bounds = array<i64: 1, 32>}, {pipeline_mode = #tpu.pipeline_mode<synchronous>, transform_indices = @transform_2, window_bounds = array<i64: 32, 32>}, {pipeline_mode = #tpu.pipeline_mode<synchronous>, transform_indices = @transform_3, window_bounds = array<i64: 32, 32>}, {pipeline_mode = #tpu.pipeline_mode<synchronous>, transform_indices = @transform_4, window_bounds = array<i64: 32, 32>}, {pipeline_mode = #tpu.pipeline_mode<synchronous>, transform_indices = @transform_5, window_bounds = array<i64: 1, 16>}, {pipeline_mode = #tpu.pipeline_mode<synchronous>, transform_indices = @transform_6, window_bounds = array<i64: 1, 16>}, {transform_indices = @transform_7, window_bounds = array<i64: 1, 2, 8, 16>}, {transform_indices = @transform_8, window_bounds = array<i64: 1, 2, 8, 16>}, {transform_indices = @transform_9, window_bounds = array<i64: 1, 2, 8, 16>}]} {
    %c0 = arith.constant 0 : index
    %c0_0 = arith.constant 0 : index
    %c0_1 = arith.constant 0 : index
    %0 = vector.load %arg2[%c0, %c0_0, %c0_1] : memref<1x8x32xf32, #tpu.memory_space<vmem>>, vector<1x8x32xf32>
    %1 = vector.shape_cast %0 : vector<1x8x32xf32> to vector<8x32xf32>
    %cst = arith.constant dense<0.000000e+00> : vector<8xf32>
    %2 = vector.multi_reduction <add>, %1, %cst [1] : vector<8x32xf32> to vector<8xf32>
    %3 = vector.shape_cast %2 : vector<8xf32> to vector<8x1xf32>
    %cst_2 = arith.constant 3.200000e+01 : f32
    %4 = vector.broadcast %cst_2 : f32 to vector<8x1xf32>
    %5 = arith.divf %3, %4 : vector<8x1xf32>
    %6 = vector.broadcast %5 : vector<8x1xf32> to vector<8x32xf32>
    %7 = arith.subf %1, %6 : vector<8x32xf32>
    %8 = arith.mulf %7, %7 : vector<8x32xf32>
    %cst_3 = arith.constant dense<0.000000e+00> : vector<8xf32>
    %9 = vector.multi_reduction <add>, %8, %cst_3 [1] : vector<8x32xf32> to vector<8xf32>
    %10 = vector.shape_cast %9 : vector<8xf32> to vector<8x1xf32>
    %cst_4 = arith.constant 3.200000e+01 : f32
    %11 = vector.broadcast %cst_4 : f32 to vector<8x1xf32>
    %12 = arith.divf %10, %11 : vector<8x1xf32>
    %cst_5 = arith.constant 9.99999974E-6 : f32
    %13 = vector.broadcast %cst_5 : f32 to vector<8x1xf32>
    %14 = arith.addf %12, %13 : vector<8x1xf32>
    %15 = math.rsqrt %14 : vector<8x1xf32>
    %16 = vector.broadcast %15 : vector<8x1xf32> to vector<8x32xf32>
    %17 = arith.mulf %7, %16 : vector<8x32xf32>
    %c0_6 = arith.constant 0 : index
    %c0_7 = arith.constant 0 : index
    %18 = vector.load %arg3[%c0_6, %c0_7] : memref<1x32xf32, #tpu.memory_space<vmem>>, vector<1x32xf32>
    %19 = vector.broadcast %18 : vector<1x32xf32> to vector<8x32xf32>
    %20 = arith.mulf %17, %19 : vector<8x32xf32>
    %21 = arith.truncf %20 : vector<8x32xf32> to vector<8x32xbf16>
    %c0_8 = arith.constant 0 : index
    %c0_9 = arith.constant 0 : index
    %22 = vector.load %arg4[%c0_8, %c0_9] : memref<32x32xbf16, #tpu.memory_space<vmem>>, vector<32x32xbf16>
    %cst_10 = arith.constant dense<0.000000e+00> : vector<8x32xf32>
    %23 = tpu.matmul %21, %22, %cst_10 {dimension_numbers = #tpu.dot_dimension_numbers<[1], [0], [0], [1], [0, 0, 1, 1], [], []>} : vector<8x32xbf16>, vector<32x32xbf16>, vector<8x32xf32> -> vector<8x32xf32>
    %c0_11 = arith.constant 0 : index
    %c0_12 = arith.constant 0 : index
    %24 = vector.load %arg5[%c0_11, %c0_12] : memref<32x32xbf16, #tpu.memory_space<vmem>>, vector<32x32xbf16>
    %cst_13 = arith.constant dense<0.000000e+00> : vector<8x32xf32>
    %25 = tpu.matmul %21, %24, %cst_13 {dimension_numbers = #tpu.dot_dimension_numbers<[1], [0], [0], [1], [0, 0, 1, 1], [], []>} : vector<8x32xbf16>, vector<32x32xbf16>, vector<8x32xf32> -> vector<8x32xf32>
    %c0_14 = arith.constant 0 : index
    %c0_15 = arith.constant 0 : index
    %26 = vector.load %arg6[%c0_14, %c0_15] : memref<32x32xbf16, #tpu.memory_space<vmem>>, vector<32x32xbf16>
    %cst_16 = arith.constant dense<0.000000e+00> : vector<8x32xf32>
    %27 = tpu.matmul %21, %26, %cst_16 {dimension_numbers = #tpu.dot_dimension_numbers<[1], [0], [0], [1], [0, 0, 1, 1], [], []>} : vector<8x32xbf16>, vector<32x32xbf16>, vector<8x32xf32> -> vector<8x32xf32>
    %c0_17 = arith.constant 0 : index
    %c0_18 = arith.constant 0 : index
    %28 = vector.load %arg7[%c0_17, %c0_18] : memref<1x16xf32, #tpu.memory_space<vmem>>, vector<1x16xf32>
    %c0_19 = arith.constant 0 : index
    %c0_20 = arith.constant 0 : index
    %29 = vector.load %arg8[%c0_19, %c0_20] : memref<1x16xf32, #tpu.memory_space<vmem>>, vector<1x16xf32>
    %30 = vector.extract_strided_slice %23 {offsets = [0, 0], sizes = [8, 16], strides = [1, 1]} : vector<8x32xf32> to vector<8x16xf32>
    %31 = arith.mulf %30, %30 : vector<8x16xf32>
    %cst_21 = arith.constant dense<0.000000e+00> : vector<8xf32>
    %32 = vector.multi_reduction <add>, %31, %cst_21 [1] : vector<8x16xf32> to vector<8xf32>
    %33 = vector.shape_cast %32 : vector<8xf32> to vector<8x1xf32>
    %cst_22 = arith.constant 1.000000e-24 : f32
    %34 = vector.broadcast %cst_22 : f32 to vector<8x1xf32>
    %35 = arith.maximumf %33, %34 : vector<8x1xf32>
    %36 = math.rsqrt %35 : vector<8x1xf32>
    %37 = vector.broadcast %36 : vector<8x1xf32> to vector<8x16xf32>
    %38 = arith.mulf %30, %37 : vector<8x16xf32>
    %39 = vector.broadcast %28 : vector<1x16xf32> to vector<8x16xf32>
    %40 = arith.mulf %38, %39 : vector<8x16xf32>
    %41 = arith.truncf %40 : vector<8x16xf32> to vector<8x16xbf16>
    %c0_23 = arith.constant 0 : index
    %c0_24 = arith.constant 0 : index
    %c0_25 = arith.constant 0 : index
    %c0_26 = arith.constant 0 : index
    %42 = vector.load %arg9[%c0_23, %c0_24, %c0_25, %c0_26] : memref<1x2x8x16xbf16, #tpu.memory_space<vmem>>, vector<1x1x8x16xbf16>
    %43 = vector.shape_cast %42 : vector<1x1x8x16xbf16> to vector<8x16xbf16>
    %44 = vector.shape_cast %41 : vector<8x16xbf16> to vector<1x1x8x16xbf16>
    tpu.vector_store %arg9[%c0_23, %c0_24, %c0_25, %c0_26], %44 {strides = array<i32>} : memref<1x2x8x16xbf16, #tpu.memory_space<vmem>>, vector<1x1x8x16xbf16>,
    %45 = vector.extract_strided_slice %25 {offsets = [0, 0], sizes = [8, 16], strides = [1, 1]} : vector<8x32xf32> to vector<8x16xf32>
    %46 = arith.mulf %45, %45 : vector<8x16xf32>
    %cst_27 = arith.constant dense<0.000000e+00> : vector<8xf32>
    %47 = vector.multi_reduction <add>, %46, %cst_27 [1] : vector<8x16xf32> to vector<8xf32>
    %48 = vector.shape_cast %47 : vector<8xf32> to vector<8x1xf32>
    %cst_28 = arith.constant 1.000000e-24 : f32
    %49 = vector.broadcast %cst_28 : f32 to vector<8x1xf32>
    %50 = arith.maximumf %48, %49 : vector<8x1xf32>
    %51 = math.rsqrt %50 : vector<8x1xf32>
    %52 = vector.broadcast %51 : vector<8x1xf32> to vector<8x16xf32>
    %53 = arith.mulf %45, %52 : vector<8x16xf32>
    %54 = vector.broadcast %29 : vector<1x16xf32> to vector<8x16xf32>
    %55 = arith.mulf %53, %54 : vector<8x16xf32>
    %56 = arith.truncf %55 : vector<8x16xf32> to vector<8x16xbf16>
    %c0_29 = arith.constant 0 : index
    %c0_30 = arith.constant 0 : index
    %c0_31 = arith.constant 0 : index
    %c0_32 = arith.constant 0 : index
    %57 = vector.load %arg10[%c0_29, %c0_30, %c0_31, %c0_32] : memref<1x2x8x16xbf16, #tpu.memory_space<vmem>>, vector<1x1x8x16xbf16>
    %58 = vector.shape_cast %57 : vector<1x1x8x16xbf16> to vector<8x16xbf16>
    %59 = vector.shape_cast %56 : vector<8x16xbf16> to vector<1x1x8x16xbf16>
    tpu.vector_store %arg10[%c0_29, %c0_30, %c0_31, %c0_32], %59 {strides = array<i32>} : memref<1x2x8x16xbf16, #tpu.memory_space<vmem>>, vector<1x1x8x16xbf16>,
    %60 = vector.extract_strided_slice %27 {offsets = [0, 0], sizes = [8, 16], strides = [1, 1]} : vector<8x32xf32> to vector<8x16xf32>
    %61 = arith.truncf %60 : vector<8x16xf32> to vector<8x16xbf16>
    %c0_33 = arith.constant 0 : index
    %c0_34 = arith.constant 0 : index
    %c0_35 = arith.constant 0 : index
    %c0_36 = arith.constant 0 : index
    %62 = vector.load %arg11[%c0_33, %c0_34, %c0_35, %c0_36] : memref<1x2x8x16xbf16, #tpu.memory_space<vmem>>, vector<1x1x8x16xbf16>
    %63 = vector.shape_cast %62 : vector<1x1x8x16xbf16> to vector<8x16xbf16>
    %64 = vector.shape_cast %61 : vector<8x16xbf16> to vector<1x1x8x16xbf16>
    tpu.vector_store %arg11[%c0_33, %c0_34, %c0_35, %c0_36], %64 {strides = array<i32>} : memref<1x2x8x16xbf16, #tpu.memory_space<vmem>>, vector<1x1x8x16xbf16>,
    %65 = vector.extract_strided_slice %23 {offsets = [0, 16], sizes = [8, 16], strides = [1, 1]} : vector<8x32xf32> to vector<8x16xf32>
    %66 = arith.mulf %65, %65 : vector<8x16xf32>
    %cst_37 = arith.constant dense<0.000000e+00> : vector<8xf32>
    %67 = vector.multi_reduction <add>, %66, %cst_37 [1] : vector<8x16xf32> to vector<8xf32>
    %68 = vector.shape_cast %67 : vector<8xf32> to vector<8x1xf32>
    %cst_38 = arith.constant 1.000000e-24 : f32
    %69 = vector.broadcast %cst_38 : f32 to vector<8x1xf32>
    %70 = arith.maximumf %68, %69 : vector<8x1xf32>
    %71 = math.rsqrt %70 : vector<8x1xf32>
    %72 = vector.broadcast %71 : vector<8x1xf32> to vector<8x16xf32>
    %73 = arith.mulf %65, %72 : vector<8x16xf32>
    %74 = vector.broadcast %28 : vector<1x16xf32> to vector<8x16xf32>
    %75 = arith.mulf %73, %74 : vector<8x16xf32>
    %76 = arith.truncf %75 : vector<8x16xf32> to vector<8x16xbf16>
    %c0_39 = arith.constant 0 : index
    %c1 = arith.constant 1 : index
    %c0_40 = arith.constant 0 : index
    %c0_41 = arith.constant 0 : index
    %77 = vector.load %arg9[%c0_39, %c1, %c0_40, %c0_41] : memref<1x2x8x16xbf16, #tpu.memory_space<vmem>>, vector<1x1x8x16xbf16>
    %78 = vector.shape_cast %77 : vector<1x1x8x16xbf16> to vector<8x16xbf16>
    %79 = vector.shape_cast %76 : vector<8x16xbf16> to vector<1x1x8x16xbf16>
    tpu.vector_store %arg9[%c0_39, %c1, %c0_40, %c0_41], %79 {strides = array<i32>} : memref<1x2x8x16xbf16, #tpu.memory_space<vmem>>, vector<1x1x8x16xbf16>,
    %80 = vector.extract_strided_slice %25 {offsets = [0, 16], sizes = [8, 16], strides = [1, 1]} : vector<8x32xf32> to vector<8x16xf32>
    %81 = arith.mulf %80, %80 : vector<8x16xf32>
    %cst_42 = arith.constant dense<0.000000e+00> : vector<8xf32>
    %82 = vector.multi_reduction <add>, %81, %cst_42 [1] : vector<8x16xf32> to vector<8xf32>
    %83 = vector.shape_cast %82 : vector<8xf32> to vector<8x1xf32>
    %cst_43 = arith.constant 1.000000e-24 : f32
    %84 = vector.broadcast %cst_43 : f32 to vector<8x1xf32>
    %85 = arith.maximumf %83, %84 : vector<8x1xf32>
    %86 = math.rsqrt %85 : vector<8x1xf32>
    %87 = vector.broadcast %86 : vector<8x1xf32> to vector<8x16xf32>
    %88 = arith.mulf %80, %87 : vector<8x16xf32>
    %89 = vector.broadcast %29 : vector<1x16xf32> to vector<8x16xf32>
    %90 = arith.mulf %88, %89 : vector<8x16xf32>
    %91 = arith.truncf %90 : vector<8x16xf32> to vector<8x16xbf16>
    %c0_44 = arith.constant 0 : index
    %c1_45 = arith.constant 1 : index
    %c0_46 = arith.constant 0 : index
    %c0_47 = arith.constant 0 : index
    %92 = vector.load %arg10[%c0_44, %c1_45, %c0_46, %c0_47] : memref<1x2x8x16xbf16, #tpu.memory_space<vmem>>, vector<1x1x8x16xbf16>
    %93 = vector.shape_cast %92 : vector<1x1x8x16xbf16> to vector<8x16xbf16>
    %94 = vector.shape_cast %91 : vector<8x16xbf16> to vector<1x1x8x16xbf16>
    tpu.vector_store %arg10[%c0_44, %c1_45, %c0_46, %c0_47], %94 {strides = array<i32>} : memref<1x2x8x16xbf16, #tpu.memory_space<vmem>>, vector<1x1x8x16xbf16>,
    %95 = vector.extract_strided_slice %27 {offsets = [0, 16], sizes = [8, 16], strides = [1, 1]} : vector<8x32xf32> to vector<8x16xf32>
    %96 = arith.truncf %95 : vector<8x16xf32> to vector<8x16xbf16>
    %c0_48 = arith.constant 0 : index
    %c1_49 = arith.constant 1 : index
    %c0_50 = arith.constant 0 : index
    %c0_51 = arith.constant 0 : index
    %97 = vector.load %arg11[%c0_48, %c1_49, %c0_50, %c0_51] : memref<1x2x8x16xbf16, #tpu.memory_space<vmem>>, vector<1x1x8x16xbf16>
    %98 = vector.shape_cast %97 : vector<1x1x8x16xbf16> to vector<8x16xbf16>
    %99 = vector.shape_cast %96 : vector<8x16xbf16> to vector<1x1x8x16xbf16>
    tpu.vector_store %arg11[%c0_48, %c1_49, %c0_50, %c0_51], %99 {strides = array<i32>} : memref<1x2x8x16xbf16, #tpu.memory_space<vmem>>, vector<1x1x8x16xbf16>,
    return
  }
  func.func @transform_0(%arg0: i32, %arg1: i32) -> (i32, i32, i32) {
    %c0_i32 = arith.constant 0 : i32
    %c0_i32_0 = arith.constant 0 : i32
    return %arg0, %arg1, %c0_i32 : i32, i32, i32
  }
  func.func @transform_1(%arg0: i32, %arg1: i32) -> (i32, i32) {
    %c0_i32 = arith.constant 0 : i32
    %c0_i32_0 = arith.constant 0 : i32
    %c0_i32_1 = arith.constant 0 : i32
    return %c0_i32, %c0_i32_0 : i32, i32
  }
  func.func @transform_2(%arg0: i32, %arg1: i32) -> (i32, i32) {
    %c0_i32 = arith.constant 0 : i32
    %c0_i32_0 = arith.constant 0 : i32
    %c0_i32_1 = arith.constant 0 : i32
    return %c0_i32, %c0_i32_0 : i32, i32
  }
  func.func @transform_3(%arg0: i32, %arg1: i32) -> (i32, i32) {
    %c0_i32 = arith.constant 0 : i32
    %c0_i32_0 = arith.constant 0 : i32
    %c0_i32_1 = arith.constant 0 : i32
    return %c0_i32, %c0_i32_0 : i32, i32
  }
  func.func @transform_4(%arg0: i32, %arg1: i32) -> (i32, i32) {
    %c0_i32 = arith.constant 0 : i32
    %c0_i32_0 = arith.constant 0 : i32
    %c0_i32_1 = arith.constant 0 : i32
    return %c0_i32, %c0_i32_0 : i32, i32
  }
  func.func @transform_5(%arg0: i32, %arg1: i32) -> (i32, i32) {
    %c0_i32 = arith.constant 0 : i32
    %c0_i32_0 = arith.constant 0 : i32
    %c0_i32_1 = arith.constant 0 : i32
    return %c0_i32, %c0_i32_0 : i32, i32
  }
  func.func @transform_6(%arg0: i32, %arg1: i32) -> (i32, i32) {
    %c0_i32 = arith.constant 0 : i32
    %c0_i32_0 = arith.constant 0 : i32
    %c0_i32_1 = arith.constant 0 : i32
    return %c0_i32, %c0_i32_0 : i32, i32
  }
  func.func @transform_7(%arg0: i32, %arg1: i32) -> (i32, i32, i32, i32) {
    %c0_i32 = arith.constant 0 : i32
    %c0_i32_0 = arith.constant 0 : i32
    %c0_i32_1 = arith.constant 0 : i32
    return %arg0, %c0_i32, %arg1, %c0_i32_0 : i32, i32, i32, i32
  }
  func.func @transform_8(%arg0: i32, %arg1: i32) -> (i32, i32, i32, i32) {
    %c0_i32 = arith.constant 0 : i32
    %c0_i32_0 = arith.constant 0 : i32
    %c0_i32_1 = arith.constant 0 : i32
    return %arg0, %c0_i32, %arg1, %c0_i32_0 : i32, i32, i32, i32
  }
  func.func @transform_9(%arg0: i32, %arg1: i32) -> (i32, i32, i32, i32) {
    %c0_i32 = arith.constant 0 : i32
    %c0_i32_0 = arith.constant 0 : i32
    %c0_i32_1 = arith.constant 0 : i32
    return %arg0, %c0_i32, %arg1, %c0_i32_0 : i32, i32, i32, i32
  }
}

</mosaic_0001>

<bundles_post_ra>
// kernel: tpu_custom_call.1
= control target key start
LH: loop header
LB: loop body
LE: loop exit
PB: predicated region body
PF: predicated region fallthrough
CT: control target
= control target key end

     0   :  { %s1802_s0 = inlined_call_operand.hbm [shape: f32[2,8,32], index: 0, kind: input, shape index: {}]   ;;  %s1803_s1 = inlined_call_operand.vmem [shape: f32[1,32], index: 1, kind: input, shape index: {}]   ;;  %s1804_s2 = inlined_call_operand.hbm [shape: bf16[32,32], index: 2, kind: input, shape index: {}]   ;;  %s1805_s3 = inlined_call_operand.hbm [shape: bf16[32,32], index: 3, kind: input, shape index: {}]   ;;  %s1806_s4 = inlined_call_operand.hbm [shape: bf16[32,32], index: 4, kind: input, shape index: {}]   ;;  %s1807_s5 = inlined_call_operand.vmem [shape: f32[1,16], index: 5, kind: input, shape index: {}]   ;;  %s1808_s6 = inlined_call_operand.vmem [shape: f32[1,16], index: 6, kind: input, shape index: {}]   ;;  %s1809_s7 = inlined_call_operand.hbm [shape: bf16[2,2,8,16], index: 7, kind: output, shape index: {0}]   ;;  %s1810_s8 = inlined_call_operand.hbm [shape: bf16[2,2,8,16], index: 8, kind: output, shape index: {1}]   ;;  %s1811_s9 = inlined_call_operand.hbm [shape: bf16[2,2,8,16], index: 9, kind: output, shape index: {2}]  }
   0x1   :  { %1817 = sst [smem:[#allocation21_spill]] %s1802_s0 }
   0x2   :  { %1818 = sst [smem:[#allocation22_spill]] %s1803_s1 }
   0x3   :  { %1819 = sst [smem:[#allocation23_spill]] %s1804_s2 }
   0x4   :  { %1820 = sst [smem:[#allocation24_spill]] %s1805_s3 }
   0x5   :  { %1821 = sst [smem:[#allocation25_spill]] %s1806_s4 }
   0x6   :  { %15 = vsyncpa [#allocation3], 0 }
   0x7   :  { %17 = vsyncpa [#allocation3 + $0x1], 0 }
   0x8   :  { %18 = vsyncpa [#allocation6], 0 }
   0x9   :  { %19 = vsyncpa [#allocation9], 0 }
   0xa   :  { %20 = vsyncpa [#allocation4], 0 }
   0xb   :  { %22 = vsyncpa [#allocation4 + $0x1], 0 }
   0xc   :  { %23 = vsyncpa [#allocation12], 0 }
   0xd   :  { %25 = vsyncpa [#allocation12 + $0x1], 0  ;;  %s1486_s30 = smov 0   ;;  %s1488_s10 = smov 0  }
   0xe   :  { %s1490_s11 = smov 0   ;;  %s1492_s12 = smov 0  }
   0xf   :  { %s1494_s13 = smov 0   ;;  %s1496_s14 = smov 0  }
  0x10 LB: > { %s1517_s15 = sadd.s32 4294967295, %s1419_s14   ;;  %s1813_s16 = sadd.s32 4294967294, %s1419_s14   ;;  %s1419_s14 = sphi %s1496_s14, %s31_s14   ;;  %s1415_s13 = sphi %s1494_s13, %s1850_s13   ;;  %s1411_s12 = sphi %s1492_s12, %s1849_s12   ;;  %s1407_s11 = sphi %s1490_s11, %s1848_s11   ;;  %s1403_s10 = sphi %s1488_s10, %s1847_s10   ;;  %s1399_s30 = sphi %s1486_s30, %s1846_s30  }
  0x11   : > { %p65_p0 = scmp.ne.s32.totalorder %s1403_s10, %s1399_s30  ;;  %p1812_p1 = scmp.eq.s32.totalorder %s1517_s15, 0 }
  0x12   : > { %p223_p3 = scmp.eq.s32.totalorder %s1813_s16, 1  ;;  %p959_p5 = scmp.ge.s32.totalorder %s1419_s14, 1 }
  0x13   : > { %p1528_p4 = por %p1812_p1, %p65_p0  ;;  %p286_p7 = scmp.lt.s32.totalorder %s1419_s14, 3 }
  0x14   : > { %p1533_p6 = por %p223_p3, %p65_p0  ;;  %s1421_s20 = smov [#allocation5]  }
  0x15   : > { %s1822_s17 = scalar_select %p1528_p4, 1, 0 }
  0x16   : > { %s1823_s18 = scalar_select %p1533_p6, 1, 0 }
  0x17   : > { %p1538_p8 = pnand %p959_p5, %p286_p7  ;;  %s301_s21 = sshll.u32 %s1421_s20, 4  ;;  %s302_s21 = int_to_ptr.vmem [resolvable:$true] %s301_s21 }
  0x18   : > { %1824 = sst [smem:[#allocation19_spill]] %s1823_s18  ;;  %s1422_s23 = smov [#allocation7]  }
  0x19   : > { %p1062_p9 = pneg %p1538_p8  ;;  %s314_s24 = sshll.u32 %s1422_s23, 4  ;;  %s315_s24 = int_to_ptr.vmem [resolvable:$true] %s314_s24 }
  0x1a   : > { %s1423_s25 = smov [#allocation8]   ;;  %s1180_s27 = scalar_lea.vmem %s302_s21, 256 }
  0x1b   : > { %p1547_p11 = pnand %p1062_p9, %p1812_p1  ;;  %s327_s26 = sshll.u32 %s1423_s25, 4  ;;  %s328_s26 = int_to_ptr.vmem [resolvable:$true] %s327_s26 }
  0x1c   : > { %p1181_p13 = scmp.ne.s32.totalorder %s302_s21, %s1180_s27  ;;  %p1188_p5 = scmp.lt.s32.totalorder %s302_s21, %s302_s21 }
  0x1d   : > { %p1171_p12 = pneg %p1547_p11  ;;  %p1189_p7 = scmp.lt.s32.totalorder %s1180_s27, %s1180_s27 }
  0x1f   : > { %p1183_p0 = pnand %p1181_p13, %p1171_p12  ;;  %p1190_p9 = por %p1189_p7, %p1188_p5 }
  0x21   : > { %p1184_p3 = pneg %p1183_p0 }
  0x23   : > { %p1191_p10 = pnand %p1190_p9, %p1184_p3 }
  0x25   : > { %1194 = shalt.err (!%p1191_p10)
}
  0x26   : > { %s1424_s28 = smov 64   ;;  %s1425_s29 = smov 4  }
  0x27   : > { %s1827_s2 = sld [smem:[#allocation23_spill]]  ;;  %s1206_s25 = scalar_lea.vmem %s315_s24, 256 }
  0x28   : > { %p1207_p1 = scmp.ne.s32.totalorder %s315_s24, %s1206_s25  ;;  %p1214_p2 = scmp.lt.s32.totalorder %s315_s24, %s315_s24 }
  0x29   : > { %p1215_p6 = scmp.lt.s32.totalorder %s1206_s25, %s1206_s25 }
  0x2a   : > { %p1209_p13 = pnand %p1207_p1, %p1171_p12 }
  0x2b   : > { %p1216_p5 = por %p1215_p6, %p1214_p2 }
  0x2c   : > { %p1210_p0 = pneg %p1209_p13 }
  0x2d   : > { %1065 = dma.hbm_to_vmem [thread:$0]  (!%p1547_p11), %s1827_s2, 256, %s302_s21, [#allocation6], %s1424_s28, %s1424_s28, %s1425_s29  }
  0x2e   : > { %p1217_p3 = pnand %p1216_p5, %p1210_p0 }
  0x30   : > { %1220 = shalt.err (!%p1217_p3)
}
  0x31   : > { %s1828_s3 = sld [smem:[#allocation24_spill]]  ;;  %s1232_s21 = scalar_lea.vmem %s328_s26, 256 }
  0x32   : > { %p1233_p10 = scmp.ne.s32.totalorder %s328_s26, %s1232_s21  ;;  %p1240_p9 = scmp.lt.s32.totalorder %s328_s26, %s328_s26 }
  0x33   : > { %p1241_p13 = scmp.lt.s32.totalorder %s1232_s21, %s1232_s21 }
  0x34   : > { %p1235_p7 = pnand %p1233_p10, %p1171_p12 }
  0x35   : > { %p1242_p4 = por %p1241_p13, %p1240_p9 }
  0x36   : > { %p1236_p1 = pneg %p1235_p7 }
  0x37   : > { %1068 = dma.hbm_to_vmem [thread:$0]  (!%p1547_p11), %s1828_s3, 256, %s315_s24, [#allocation6], %s1424_s28, %s1424_s28, %s1425_s29  }
  0x38   : > { %p1243_p2 = pnand %p1242_p4, %p1236_p1 }
  0x3a   : > { %1246 = shalt.err (!%p1243_p2)
}
  0x3b   : > { %s1829_s4 = sld [smem:[#allocation25_spill]]  ;;  %s52_s16 = sadd.s32 1, %s1407_s11 }
  0x3c   : > { %s43_s24 = sadd.s32 1, %s1415_s13  ;;  %p59_p4 = scmp.ne.s32.totalorder %s1407_s11, %s1403_s10 }
  0x3d   : > { %p45_p6 = scmp.ge.s32.totalorder %s43_s24, 2  ;;  %p60_p12 = scmp.eq.s32.totalorder %s1419_s14, 0 }
  0x3e   : > { %p1830_p0 = scmp.eq.s32.totalorder %s1517_s15, 1  ;;  %p1089_p3 = scmp.lt.s32.totalorder %s1419_s14, 2 }
  0x3f   : > { %s1852_s24 = smov (%p45_p6, %s43_s24), 0  ;;  %p61_p10 = por %p60_p12, %p59_p4 }
  0x40   : > { %p1584_p5 = por %p1830_p0, %p59_p4  ;;  %1832 = sst [smem:[#allocation20_spill]] %s1852_s24 }
  0x41   : > { %1071 = dma.hbm_to_vmem [thread:$0]  (!%p1547_p11), %s1829_s4, 256, %s328_s26, [#allocation9], %s1424_s28, %s1424_s28, %s1425_s29  }
  0x42   : > { %s347_s25 = sand.u32 1, %s1407_s11   ;;  %s47_s27 = ssub.s32 %s1415_s13, %s1852_s24 }
  0x43   : > { %p50_p7 = scmp.eq.s32.totalorder %s47_s27, 0  ;;  %s964_s26 = sshll.u32 %s347_s25, 3 }
  0x44   : > { %s965_s28 = sshll.u32 %s1415_s13, 7  ;;  %s1833_s0 = sld [smem:[#allocation21_spill]] }
  0x45   : > { %s1596_s29 = scalar_select %p50_p7, %s1407_s11, %s52_s16  }
  0x46   : > { %s351_s2 = scalar_lea.vmem [#allocation2], %s964_s26  ;;  %p1603_p11 = pnand %p1089_p3, %p61_p10 }
  0x47   : > { %s359_s3 = sshll.u32 %s351_s2, 4  ;;  %s348_s18 = scalar_lea.sflag [#allocation3], %s347_s25  ;;  %s360_s3 = int_to_ptr.vmem [resolvable:$true] %s359_s3 }
  0x48   : > { %p1249_p1 = pneg %p1603_p11  ;;  %s1260_s27 = scalar_lea.vmem %s360_s3, 128 }
  0x49   : > { %p1261_p9 = scmp.ne.s32.totalorder %s360_s3, %s1260_s27  ;;  %s1426_s16 = smov [#allocation2]  }
  0x4a   : > { %s357_s23 = scalar_lea.hbm %s1833_s0, %s965_s28  ;;  %s1265_s24 = sshll.u32 %s1426_s16, 4  ;;  %s1266_s24 = int_to_ptr.vmem [resolvable:$false] %s1265_s24 }
  0x4b   : > { %p1263_p13 = pnand %p1261_p9, %p1249_p1  ;;  %s1267_s28 = scalar_lea.vmem %s1266_s24, 256 }
  0x4c   : > { %p1268_p4 = scmp.lt.s32.totalorder %s360_s3, %s1266_s24  ;;  %p1269_p6 = scmp.lt.s32.totalorder %s1267_s28, %s1260_s27 }
  0x4d   : > { %p1264_p2 = pneg %p1263_p13 }
  0x4e   : > { %p1270_p12 = por %p1269_p6, %p1268_p4 }
  0x50   : > { %p1271_p0 = pnand %p1270_p12, %p1264_p2 }
  0x52   : > { %1274 = shalt.err (!%p1271_p0)
}
  0x53   : > { %1075 = dma.hbm_to_vmem [thread:$0]  (!%p1603_p11), %s357_s23, 128, %s360_s3, %s348_s18  }
  0x54   : > { %368 = sbr.rel (%p1538_p8) target bundleno = 1049 (0x419), region = 48  ;;  %s1614_s2 = sand.u32 (!%p1538_p8), 1, %s1403_s10  }
  0x55   : > { %s1617_s25 = sshll.u32 (!%p1538_p8), %s1614_s2, 3  ;;  %s371_s24 = scalar_lea.sflag (!%p1538_p8), [#allocation3], %s1614_s2 }
  0x56   : > { %s374_s26 = scalar_lea.vmem (!%p1538_p8), [#allocation2], %s1617_s25  ;;  %p1835_p3 = scmp.ne.s32.totalorder (!%p1538_p8), %s1822_s17, 0 }
  0x59   : > { %1378 = dma.done.wait (%p1835_p3), %s371_s24, 128  }
  0x5a   : > { %1380 = vsyncadd (%p1835_p3), %s371_s24, 4294967168  ;;  %p1836_p10 = scmp.eq.s32.totalorder %s1517_s15, 0 }
  0x5c   : > { %1382 = dma.done.wait (%p1836_p10), [#allocation6], 512   ;;  %p1837_p8 = pmov %p1836_p10 }
  0x5e   : > { %1384 = vsyncadd (%p1837_p8), [#allocation6], 4294966784  ;;  %p1838_p7 = pmov %p1837_p8 }
  0x60   : > { %1386 = dma.done.wait (%p1838_p7), [#allocation9], 256   ;;  %p1839_p11 = pmov %p1838_p7 }
  0x61   : > { %vm433_vm0 = vcmask 261120   ;;  %v432_v0 = vld [vmem:[%s374_s26] sm:$0xff]  ;;  %v1153_v7 = vld [vmem:[#allocation5 + $0x8] sm:$0xff]   ;;  %v1427_v9 = vmov 0.0   ;;  %v1155_v10 = vld [vmem:[#allocation5] sm:$0xff]   ;;  %vm1428_vm1 = vmmov 0  }
  0x62   : > { %1388 = vsyncadd (%p1839_p11), [#allocation9], 4294967040  ;;  %v434_v1 = vsel %vm433_vm0, %v432_v0, 0.0  ;;  %v1154_v8 = vld [vmem:[#allocation7 + $0x8] sm:$0xff]   ;;  %1018 = vmatprep.subr.bf16.mxu0 %v1427_v9  ;;  %1026 = vmatprep.subr.bf16.mxu1 %v1427_v9  ;;  %v1156_v11 = vld [vmem:[#allocation7] sm:$0xff]   ;;  %s1840_s1 = sld [smem:[#allocation22_spill]] }
  0x63   : > { %435 = vadd.xlane.f32.xlu0 %v434_v1  ;;  %1019 = vmatpush3.bf16.msra.mxu0 %v1153_v7  ;;  %v1157_v19 = vld [vmem:[#allocation8 + $0x8] sm:$0xff]   ;;  %v1158_v21 = vld [vmem:[#allocation8] sm:$0xff]   ;;  %s1429_s17 = smov 112   ;;  %vm646_vm2 = vcmask 125952   ;;  %s1651_s18 = scalar_lea.vmem [#allocation13], %s1617_s25  ;;  %vm631_vm3 = vcmask 130048  }
  0x64   : > { %1027 = vmatpush3.bf16.msra.mxu1 %v1154_v8  ;;  %1020 = vmatprep.subr.bf16.mxu0 %v1427_v9  ;;  %v985_v42 = vld [vmem:[%s1808_s6] ss:$0 sm:$0xff]  ;;  %s1430_s20 = smov 16   ;;  %s1666_s16 = scalar_lea.vmem [#allocation10], %s1617_s25 }
  0x65   : > { %1028 = vmatprep.subr.bf16.mxu1 %v1427_v9  ;;  %1022 = vmatprep.mubr.msk.bf16.mxu0 %vm1428_vm1, %v1427_v9  ;;  %v984_v43 = vld [vmem:[%s1807_s5] ss:$0 sm:$0xff]  ;;  %s423_s28 = scalar_lea.vmem [#allocation11], %s1617_s25  ;;  %s779_s24 = sshll.u32 %s1651_s18, 4  ;;  %s1677_s24 = int_to_ptr.vmem [resolvable:$true] %s779_s24 }
  0x66   : > { %1030 = vmatprep.mubr.msk.bf16.mxu1 %vm1428_vm1, %v1427_v9  ;;  %s762_s26 = sshll.u32 %s423_s28, 4  ;;  %s725_s3 = sand.u32 1, %s1517_s15   ;;  %s1680_s26 = int_to_ptr.vmem [resolvable:$true] %s762_s26 }
  0x67   : > { %1021 = vmatpush3.bf16.msra.mxu0 %v1155_v10  ;;  %s1006_s4 = sshll.u32 %s1411_s12, 7  ;;  %s1701_s0 = scalar_lea.sflag [#allocation12], %s725_s3 }
  0x68   : > { %1029 = vmatpush3.bf16.msra.mxu1 %v1156_v11  ;;  %1034 = vmatprep.subr.bf16.mxu0 %v1427_v9  ;;  %v974_v16 = vld [vmem:[%s1840_s1] ss:$0 sm:$0xff]  ;;  %s1693_s15 = scalar_lea.hbm %s1811_s9, %s1006_s4  ;;  %s1699_s27 = scalar_lea.hbm %s1809_s7, %s1006_s4 }
  0x69   : > { %s1275_s19 = scalar_lea.vmem %s1680_s26, 128  ;;  %s1431_s21 = smov [#allocation11]  }
  0x6a   : > { %p1276_p1 = scmp.ne.s32.totalorder %s1680_s26, %s1275_s19  ;;  %s1279_s1 = sshll.u32 %s1431_s21, 4  ;;  %s1280_s1 = int_to_ptr.vmem [resolvable:$false] %s1279_s1 }
  0x6b   : > { %s1281_s25 = scalar_lea.vmem %s1280_s1, 256  ;;  %p1282_p2 = scmp.lt.s32.totalorder %s1680_s26, %s1280_s1 }
  0x6c   : > { %p1277_p9 = pnand %p1276_p1, %p1584_p5  ;;  %p1283_p4 = scmp.lt.s32.totalorder %s1281_s25, %s1275_s19 }
  0x6e   : > { %p1278_p13 = pneg %p1277_p9  ;;  %p1284_p6 = por %p1283_p4, %p1282_p2 }
  0x70   : > { %p1285_p12 = pnand %p1284_p6, %p1278_p13 }
  0xec   : > { %v436_v2 = vpop.xlane.xlu0 %435 }
  0xed   : > { %v438_v3 = vmul.f32 0.03125, %v436_v2 }
  0xef   : > { %v439_v4 = vsub.f32 %v432_v0, %v438_v3 }
  0xf1   : > { %v440_v5 = vmul.f32 %v439_v4, %v439_v4 }
  0xf3   : > { %v441_v6 = vsel %vm433_vm0, %v440_v5, 0.0 }
  0xf4   : > { %442 = vadd.xlane.f32.xlu0 %v441_v6 }
 0x17d   : > { %v443_v12 = vpop.xlane.xlu0 %442 }
 0x17e   : > { %v444_v13 = vmul.f32 0.03125, %v443_v12 }
 0x180   : > { %v445_v14 = vadd.f32 1e-05, %v444_v13 }
 0x182   : > { %1159 = vrsqrt.f32 %v445_v14 }
 0x18f   : > { %v1160_v15 = vpop.eup %1159 }
 0x190   : > { %v447_v17 = vmul.f32 %v1160_v15, %v439_v4 }
 0x192   : > { %v455_v18 = vmul.f32 %v974_v16, %v447_v17 }
 0x194   : > { %v456_v20 = vpack.c.bf16 %v455_v18, %v455_v18 }
 0x196   : > { %1023 = vmatmul.mubr.msk.bf16.vlgmr.msra.gmra.mxu0 %vm433_vm0, %v456_v20  ;;  %1031 = vmatmul.mubr.msk.bf16.vlgmr.msra.gmra.mxu1 %vm433_vm0, %v456_v20 }
 0x197   : > { %1035 = vmatpush3.bf16.msra.mxu0 %v1157_v19  ;;  %1038 = vmatprep.mubr.msk.bf16.mxu0 %vm1428_vm1, %v1427_v9 }
 0x198   : > { %1036 = vmatprep.subr.bf16.mxu0 %v1427_v9 }
 0x19b   : > { %1037 = vmatpush3.bf16.msra.mxu0 %v1158_v21 }
 0x19e   : > { %1039 = vmatmul.mubr.msk.bf16.vlgmr.msra.gmra.mxu0 %vm433_vm0, %v456_v20 }
 0x256   : > { %v510_v22 = vpop.f32.mrf.mxu0  ;;  %v1644_v23 = vpop.f32.mrf.mxu1 }
 0x257   : > { %v648_v24 = vmul.f32 %v1644_v23, %v1644_v23  ;;  %v630_v29 = vmul.f32 %v510_v22, %v510_v22 }
 0x258   : > { %v1024_v25 = vpop.f32.mrf.mxu0  ;;  %v1032_v26 = vpop.f32.mrf.mxu1 }
 0x259   : > { %690 = vrot.lane.b32.xlu1 %v648_v24, %s1429_s17  ;;  %v632_v41 = vsel %vm631_vm3, %v630_v29, 0.0  ;;  %v649_v44 = vsel %vm631_vm3, %v648_v24, 0.0 }
 0x25a   : > { %v513_v27 = vpop.f32.mrf.mxu0  ;;  %v569_v28 = vpop.f32.mrf.mxu1 }
 0x25c   : > { %v1025_v30 = vpop.f32.mrf.mxu0  ;;  %v1033_v31 = vpop.f32.mrf.mxu1 }
 0x25d   : > { %667 = vrot.lane.b32.xlu1 %v630_v29, %s1429_s17 }
 0x25e   : > { %v622_v32 = vpop.f32.mrf.mxu0 }
 0x25f   : > { %v664_v33 = vpack.c.bf16 %v622_v32, %v622_v32 }
 0x260   : > { %v1040_v34 = vpop.f32.mrf.mxu0 }
 0x261   : > { %665 = vst.msk [vmem:[%s1651_s18] sm:$0xf] %vm646_vm2, %v664_v33 }
 0x262   : > { %v625_v35 = vpop.f32.mrf.mxu0 }
 0x264   : > { %v1041_v36 = vpop.f32.mrf.mxu0 }
 0x2cb   : > { %v691_v37 = vpop.permute.xlu1 %690 }
 0x2cc   : > { %v693_v38 = vsel %vm631_vm3, %v691_v37, 0.0 }
 0x2cd   : > { %694 = vadd.xlane.f32.xlu0 %v693_v38 }
 0x2cf   : > { %v668_v39 = vpop.permute.xlu1 %667 }
 0x2d0   : > { %v670_v40 = vsel %vm631_vm3, %v668_v39, 0.0 }
 0x2d1   : > { %671 = vadd.xlane.f32.xlu1 %v670_v40 }
 0x2d5   : > { %633 = vadd.xlane.f32.xlu1 %v632_v41 }
 0x2e3   : > { %699 = vrot.lane.b32.xlu0 %v985_v42, %s1430_s20 }
 0x2e7   : > { %676 = vrot.lane.b32.xlu0 %v984_v43, %s1430_s20  ;;  %s1686_s20 = scalar_lea.hbm %s1810_s8, %s1006_s4 }
 0x306   : > { %650 = vadd.xlane.f32.xlu0 %v649_v44 }
 0x31c   : > { %715 = vrot.lane.b32.xlu0 %v664_v33, %s1429_s17 }
 0x356   : > { %v695_v45 = vpop.xlane.xlu0 %694 }
 0x357   : > { %v696_v46 = vmax.f32 %v695_v45, 1e-24 }
 0x359   : > { %1161 = vrsqrt.f32 %v696_v46 }
 0x35a   : > { %v672_v47 = vpop.xlane.xlu1 %671  ;;  %v700_v51 = vpop.permute.xlu0 %699 }
 0x35b   : > { %v673_v48 = vmax.f32 %v672_v47, 1e-24 }
 0x35d   : > { %1163 = vrsqrt.f32 %v673_v48 }
 0x35e   : > { %v634_v49 = vpop.xlane.xlu1 %633  ;;  %v677_v56 = vpop.permute.xlu0 %676 }
 0x35f   : > { %v635_v50 = vmax.f32 %v634_v49, 1e-24 }
 0x361   : > { %1165 = vrsqrt.f32 %v635_v50 }
 0x366   : > { %v1162_v52 = vpop.eup %1161 }
 0x367   : > { %v698_v53 = vmul.f32 %v1162_v52, %v1644_v23 }
 0x369   : > { %v702_v54 = vmul.f32 %v700_v51, %v698_v53 }
 0x36a   : > { %v1164_v55 = vpop.eup %1163 }
 0x36b   : > { %v1004_v57 = vpack.c.bf16 %v702_v54, %v702_v54  ;;  %v675_v58 = vmul.f32 %v1164_v55, %v510_v22 }
 0x36d   : > { %v679_v59 = vmul.f32 %v677_v56, %v675_v58  ;;  %707 = vrot.lane.b32.xlu1 %v1004_v57, %s1429_s17 }
 0x36e   : > { %v1166_v60 = vpop.eup %1165 }
 0x36f   : > { %v637_v61 = vmul.f32 %v1166_v60, %v510_v22  ;;  %v1003_v62 = vpack.c.bf16 %v679_v59, %v679_v59 }
 0x371   : > { %v644_v63 = vmul.f32 %v984_v43, %v637_v61  ;;  %684 = vrot.lane.b32.xlu1 %v1003_v62, %s1429_s17  ;;  %s745_s17 = sshll.u32 %s1666_s16, 4  ;;  %s1688_s17 = int_to_ptr.vmem [resolvable:$true] %s745_s17 }
 0x373   : > { %v645_v0 = vpack.c.bf16 %v644_v63, %v644_v63 }
 0x375   : > { %647 = vst.msk [vmem:[%s1666_s16] sm:$0xf] %vm646_vm2, %v645_v0 }
 0x38f   : > { %v651_v1 = vpop.xlane.xlu0 %650 }
 0x390   : > { %v652_v2 = vmax.f32 %v651_v1, 1e-24 }
 0x392   : > { %1167 = vrsqrt.f32 %v652_v2 }
 0x393   : > { %v716_v3 = vpop.permute.xlu0 %715 }
 0x394   : > { %991 = vst.msk [vmem:[%s1651_s18 + $0x4] sm:$0xf] %vm646_vm2, %v716_v3 }
 0x39f   : > { %v1168_v4 = vpop.eup %1167 }
 0x3a0   : > { %v654_v5 = vmul.f32 %v1168_v4, %v1644_v23 }
 0x3a2   : > { %v661_v6 = vmul.f32 %v985_v42, %v654_v5 }
 0x3a4   : > { %v662_v7 = vpack.c.bf16 %v661_v6, %v661_v6 }
 0x3a6   : > { %663 = vst.msk [vmem:[%s423_s28] sm:$0xf] %vm646_vm2, %v662_v7 }
 0x3df   : > { %v708_v8 = vpop.permute.xlu1 %707 }
 0x3e0   : > { %989 = vst.msk [vmem:[%s423_s28 + $0x4] sm:$0xf] %vm646_vm2, %v708_v8 }
 0x3e1   : > { %1288 = shalt.err (!%p1285_p12)
}
 0x3e2   : > { %s1289_s28 = scalar_lea.hbm %s1686_s20, 128  ;;  %s1293_s18 = scalar_lea.hbm %s1810_s8, 256 }
 0x3e3   : > { %p1290_p0 = scmp.ne.s32.totalorder %s1686_s20, %s1289_s28  ;;  %p1294_p8 = scmp.lt.s32.totalorder %s1686_s20, %s1810_s8 }
 0x3e4   : > { %p1295_p7 = scmp.lt.s32.totalorder %s1293_s18, %s1289_s28 }
 0x3e5   : > { %p1291_p3 = pnand %p1290_p0, %p1584_p5 }
 0x3e6   : > { %p1296_p11 = por %p1295_p7, %p1294_p8 }
 0x3e7   : > { %p1292_p10 = pneg %p1291_p3 }
 0x3e9   : > { %p1297_p1 = pnand %p1296_p11, %p1292_p10 }
 0x3eb   : > { %1300 = shalt.err (!%p1297_p1)
}
 0x3ec   : > { %s1432_s1 = smov 64   ;;  %s1433_s19 = smov 4  }
 0x3ed   : > { %1057 = dma.vmem_to_hbm [thread:$0]  (%p1584_p5), %s1680_s26, 128, %s1686_s20, %s1701_s0, %s1432_s1, %s1432_s1, %s1433_s19  }
 0x3ee   : > { %s1301_s21 = scalar_lea.vmem %s1677_s24, 128  ;;  %s1434_s25 = smov [#allocation13]  }
 0x3ef   : > { %p1302_p9 = scmp.ne.s32.totalorder %s1677_s24, %s1301_s21  ;;  %s1305_s28 = sshll.u32 %s1434_s25, 4  ;;  %s1306_s28 = int_to_ptr.vmem [resolvable:$false] %s1305_s28 }
 0x3f0   : > { %s1307_s3 = scalar_lea.vmem %s1306_s28, 256  ;;  %p1308_p4 = scmp.lt.s32.totalorder %s1677_s24, %s1306_s28 }
 0x3f1   : > { %p1303_p13 = pnand %p1302_p9, %p1584_p5  ;;  %p1309_p6 = scmp.lt.s32.totalorder %s1307_s3, %s1301_s21 }
 0x3f3   : > { %p1304_p2 = pneg %p1303_p13  ;;  %p1310_p12 = por %p1309_p6, %p1308_p4 }
 0x3f5   : > { %p1311_p0 = pnand %p1310_p12, %p1304_p2 }
 0x3f7   : > { %1314 = shalt.err (!%p1311_p0)
}
 0x3f8   : > { %s1315_s4 = scalar_lea.hbm %s1693_s15, 128  ;;  %s1319_s18 = scalar_lea.hbm %s1811_s9, 256 }
 0x3f9   : > { %p1316_p3 = scmp.ne.s32.totalorder %s1693_s15, %s1315_s4  ;;  %p1320_p7 = scmp.lt.s32.totalorder %s1693_s15, %s1811_s9 }
 0x3fa   : > { %p1321_p11 = scmp.lt.s32.totalorder %s1319_s18, %s1315_s4 }
 0x3fb   : > { %p1317_p10 = pnand %p1316_p3, %p1584_p5 }
 0x3fc   : > { %p1322_p1 = por %p1321_p11, %p1320_p7 }
 0x3fd   : > { %p1318_p8 = pneg %p1317_p10 }
 0x3ff   : > { %p1323_p9 = pnand %p1322_p1, %p1318_p8 }
 0x401   : > { %1326 = shalt.err (!%p1323_p9)
}
 0x402   : > { %1058 = dma.vmem_to_hbm [thread:$0]  (%p1584_p5), %s1677_s24, 128, %s1693_s15, %s1701_s0, %s1432_s1, %s1432_s1, %s1433_s19   ;;  %v685_v9 = vpop.permute.xlu1 %684 }
 0x403   : > { %987 = vst.msk [vmem:[%s1666_s16 + $0x4] sm:$0xf] %vm646_vm2, %v685_v9  ;;  %s721_s21 = scalar_lea.sflag [#allocation4], %s1614_s2  ;;  %s1327_s25 = scalar_lea.vmem %s1688_s17, 128 }
 0x404   : > { %p1328_p13 = scmp.ne.s32.totalorder %s1688_s17, %s1327_s25  ;;  %s1435_s28 = smov [#allocation10]  }
 0x405   : > { %s1331_s3 = sshll.u32 %s1435_s28, 4  ;;  %s1332_s3 = int_to_ptr.vmem [resolvable:$false] %s1331_s3 }
 0x406   : > { %p1329_p2 = pnand %p1328_p13, %p1584_p5  ;;  %s1333_s4 = scalar_lea.vmem %s1332_s3, 256 }
 0x407   : > { %p1334_p6 = scmp.lt.s32.totalorder %s1688_s17, %s1332_s3  ;;  %p1335_p12 = scmp.lt.s32.totalorder %s1333_s4, %s1327_s25 }
 0x408   : > { %p1330_p4 = pneg %p1329_p2 }
 0x409   : > { %p1336_p0 = por %p1335_p12, %p1334_p6 }
 0x40b   : > { %p1337_p3 = pnand %p1336_p0, %p1330_p4 }
 0x40d   : > { %1340 = shalt.err (!%p1337_p3)
}
 0x40e   : > { %s1341_s0 = scalar_lea.hbm %s1699_s27, 128  ;;  %s1345_s24 = scalar_lea.hbm %s1809_s7, 256 }
 0x40f   : > { %p1342_p10 = scmp.ne.s32.totalorder %s1699_s27, %s1341_s0  ;;  %p1346_p11 = scmp.lt.s32.totalorder %s1699_s27, %s1809_s7 }
 0x410   : > { %p1347_p1 = scmp.lt.s32.totalorder %s1345_s24, %s1341_s0 }
 0x411   : > { %p1343_p8 = pnand %p1342_p10, %p1584_p5 }
 0x412   : > { %p1348_p9 = por %p1347_p1, %p1346_p11 }
 0x413   : > { %p1344_p7 = pneg %p1343_p8 }
 0x415   : > { %p1349_p13 = pnand %p1348_p9, %p1344_p7 }
 0x417   : > { %1352 = shalt.err (!%p1349_p13)
}
 0x418   : > { %1056 = dma.vmem_to_hbm [thread:$0]  (%p1584_p5), %s1688_s17, 128, %s1699_s27, %s721_s21, %s1432_s1, %s1432_s1, %s1433_s19  }
 0x419 PF: > { %s1841_s20 = sld [smem:[#allocation19_spill]]  ;;  %s794_s18 = sand.u32 1, %s1399_s30  }
 0x41a   : > { %p1843_p4 = scmp.ge.s32.totalorder %s1419_s14, 2  ;;  %s795_s12 = scalar_lea.sflag [#allocation4], %s794_s18 }
 0x41f   : > { %p1842_p2 = scmp.ne.s32.totalorder %s1841_s20, 0 }
 0x421   : > { %p1077_p6 = pnand %p1843_p4, %p1842_p2 }
 0x423   : > { %p1078_p12 = pneg %p1077_p6 }
 0x425   : > { %1390 = dma.done.wait (%p1078_p12), %s795_s12, 128  }
 0x426   : > { %1392 = vsyncadd (%p1078_p12), %s795_s12, 4294967168  ;;  %s1844_s22 = sadd.s32 4294967294, %s1419_s14  }
 0x427   : > { %s803_s23 = sand.u32 1, %s1844_s22  }
 0x428   : > { %s804_s25 = scalar_lea.sflag [#allocation12], %s803_s23 }
 0x429   : > { %1394 = dma.done.wait (%p1078_p12), %s804_s25, 256  }
 0x42a   : > { %1396 = vsyncadd (%p1078_p12), %s804_s25, 4294967040  ;;  %s31_s14 = sadd.s32 1, %s1419_s14   ;;  %s1845_s17 = sld [smem:[#allocation20_spill]] }
 0x42b   : > { %p28_p5 = scmp.ge.s32.totalorder %s31_s14, 4   ;;  %s1846_s30 = smov %s1403_s10 }
 0x42c   : > { %s1847_s10 = smov %s1407_s11  ;;  %s1848_s11 = smov %s1596_s29 }
 0x42d   : > { %s1849_s12 = smov %s1415_s13  ;;  %30 = sbr.rel (!%p28_p5) target bundleno = 16 (0x10), region = 140 }
 0x430   : > { %s1850_s13 = smov %s1845_s17 }
 0x432   :  { %818 = vsyncpa [#allocation3], 1 }
 0x433   :  { %820 = vsyncpa [#allocation3 + $0x1], 1 }
 0x434   :  { %821 = vsyncpa [#allocation6], 1 }
 0x435   :  { %822 = vsyncpa [#allocation9], 1 }
 0x436   :  { %823 = vsyncpa [#allocation4], 1 }
 0x437   :  { %825 = vsyncpa [#allocation4 + $0x1], 1 }
 0x438   :  { %826 = vsyncpa [#allocation12], 1 }
 0x439   :  { %828 = vsyncpa [#allocation12 + $0x1], 1 }

</bundles_post_ra>
